<compile_context>
chip_gen: v7x
topology: tpu7x:2x2x1
jax: 0.10.0
libtpu: 0.0.40
codegen_flags: <defaults>
</compile_context>

<pallas_src>
import functools

import jax
import jax.numpy as jnp
from jax.experimental import pallas as pl
from jax.experimental.pallas import tpu as pltpu

HIDDEN = 256
MAX_BATCH_TILE = 1024  # multiple of 128; ~4 MiB live VMEM -> v5e/v6e/v7x safe


def _critic_kernel(s_ref, a_ref, w1s_ref, w1a_ref, b1_ref, w2_ref, b2_ref,
                   w3_ref, b3_ref, o_ref, *, chunks):
    tb = s_ref.shape[0]
    csize = tb // chunks

    # Small operands hoisted out of the chunk loop (a couple of vregs each).
    b1 = b1_ref[...]          # (1, 256) fp32
    b2 = b2_ref[...]          # (1, 256) fp32
    w3 = w3_ref[...]          # (1, 256) fp32
    b3 = b3_ref[0]            # scalar fp32 (SMEM)

    # Static unroll over row chunks: independent chunks live in one basic block
    # so the scheduler can hide the VPU/XLU epilogue of one chunk under the
    # other chunk's layer-2 MXU matmul.
    for c in range(chunks):
        rows = pl.ds(c * csize, csize)

        s = s_ref[rows, :].astype(jnp.bfloat16)                    # (csize, S)
        a = a_ref[rows, :].astype(jnp.bfloat16)                    # (csize, A)

        # Layer 1 (split-K over the fused concat), fp32 accumulation.
        h1 = jnp.dot(s, w1s_ref[...], preferred_element_type=jnp.float32)
        h1 = h1 + jnp.dot(a, w1a_ref[...], preferred_element_type=jnp.float32)
        h1 = jnp.maximum(h1 + b1, 0.0)                             # fp32 relu

        # Layer 2: 256x256 bf16 MXU matmul (the binding unit at large B).
        h2 = jnp.dot(h1.astype(jnp.bfloat16), w2_ref[...],
                     preferred_element_type=jnp.float32)
        h2 = jnp.maximum(h2 + b2, 0.0)                             # fp32 relu

        # Layer 3 (256 -> 1): VPU multiply + lane reduce (skips the MXU), then
        # a cheap XLU transpose so the store/writeback is lane-dense.
        o_col = jnp.sum(h2 * w3, axis=-1, keepdims=True) + b3      # (csize, 1)
        o_ref[:, rows] = jnp.transpose(o_col).astype(o_ref.dtype)  # (1, csize)


def _round_up(x, m):
    return (x + m - 1) // m * m


def prepare_params(params, state_size):
    """One-time repack for the kernel: split W1, bf16 matmul weights, W3 as a
    row, b3 as an SMEM scalar. Biases stay fp32 (fp32 VPU add/relu)."""
    w1, b1, w2, b2, w3, b3 = params
    w1s = w1[:state_size].astype(jnp.bfloat16)                # (S, 256)
    w1a = w1[state_size:].astype(jnp.bfloat16)                # (A, 256)
    w2b = w2.astype(jnp.bfloat16)                             # (256, 256)
    w3row = w3.reshape(1, HIDDEN).astype(jnp.float32)         # (1, 256)
    b3s = b3.reshape((1,)).astype(jnp.float32)                # (1,) SMEM scalar
    return (w1s, w1a, b1.astype(jnp.float32), w2b,
            b2.astype(jnp.float32), w3row, b3s)


def critic_forward(state, action, prepared):
    """state: (B, S), action: (B, A) float32 -> (B, 1) float32."""
    w1s, w1a, b1, w2, b2, w3row, b3 = prepared
    B, S = state.shape
    _, A = action.shape

    # Tile selection:
    #  * B <= 128: one block equal to the full arrays (no (8,128) constraint).
    #  * else: tile ~ceil(B/2) rounded to a multiple of 128 (lane-dense output
    #    block constraint) and capped, so the grid has >= 2 steps for v7x
    #    megacore while Pallas masks the ragged last block.
    if B <= 128:
        b_tile = B
    else:
        b_tile = min(MAX_BATCH_TILE, _round_up(-(-B // 2), 128))
    grid = (pl.cdiv(B, b_tile),)

    # 2 row chunks per tile when the tile is big enough (csize stays a
    # multiple of 8); small tiles run as a single chunk.
    chunks = 2 if (b_tile >= 256 and b_tile % 16 == 0) else 1

    # Weights: same block (0,0) every grid step -> DMA'd once, VMEM-resident.
    fixed = lambda shape: pl.BlockSpec(shape, lambda i: (0, 0))

    flops = 2 * B * ((S + A) * HIDDEN + HIDDEN * HIDDEN + HIDDEN)
    bytes_accessed = (
        B * (S + A) * 4                                  # fp32 inputs
        + ((S + A) * HIDDEN + HIDDEN * HIDDEN) * 2       # bf16 weights
        + 3 * HIDDEN * 4 + 4                             # biases + W3 row + b3
        + B * 4                                          # output
    )

    out_row = pl.pallas_call(
        functools.partial(_critic_kernel, chunks=chunks),
        out_shape=jax.ShapeDtypeStruct((1, B), jnp.float32),
        grid=grid,
        in_specs=[
            pl.BlockSpec((b_tile, S), lambda i: (i, 0)),         # state tile
            pl.BlockSpec((b_tile, A), lambda i: (i, 0)),         # action tile
            fixed((S, HIDDEN)),                                  # W1_s
            fixed((A, HIDDEN)),                                  # W1_a
            fixed((1, HIDDEN)),                                  # b1
            fixed((HIDDEN, HIDDEN)),                             # W2
            fixed((1, HIDDEN)),                                  # b2
            fixed((1, HIDDEN)),                                  # W3 row
            pl.BlockSpec(memory_space=pltpu.MemorySpace.SMEM),   # b3 scalar
        ],
        out_specs=pl.BlockSpec((1, b_tile), lambda i: (0, i)),   # lane-dense
        compiler_params=pltpu.CompilerParams(
            dimension_semantics=("parallel",)),
        cost_estimate=pl.CostEstimate(
            flops=flops, transcendentals=0, bytes_accessed=bytes_accessed),
    )(state, action, w1s, w1a, b1, w2, b2, w3row, b3)

    return out_row.reshape(B, 1)  # metadata-only reshape


def init_params(key, state_size, action_size):
    """Deterministic init mirroring nn.Linear's U(-1/sqrt(fan_in), +1/sqrt(fan_in))."""
    in_dim = state_size + action_size
    ks = jax.random.split(key, 6)

    def linear(kw, kb, fan_in, fan_out):
        bound = 1.0 / jnp.sqrt(jnp.float32(fan_in))
        w = jax.random.uniform(kw, (fan_in, fan_out), jnp.float32, -bound, bound)
        b = jax.random.uniform(kb, (1, fan_out), jnp.float32, -bound, bound)
        return w, b

    w1, b1 = linear(ks[0], ks[1], in_dim, HIDDEN)
    w2, b2 = linear(ks[2], ks[3], HIDDEN, HIDDEN)
    w3, b3 = linear(ks[4], ks[5], HIDDEN, 1)
    return (w1, b1, w2, b2, w3, b3)


def critic_ref(state, action, params):
    """Pure-JAX reference mirroring the kernel's bf16-matmul / fp32-accumulate math."""
    w1, b1, w2, b2, w3, b3 = params
    x = jnp.concatenate([state, action], axis=1).astype(jnp.bfloat16)
    h1 = jnp.maximum(
        jnp.dot(x, w1.astype(jnp.bfloat16),
                preferred_element_type=jnp.float32) + b1, 0.0)
    h2 = jnp.maximum(
        jnp.dot(h1.astype(jnp.bfloat16), w2.astype(jnp.bfloat16),
                preferred_element_type=jnp.float32) + b2, 0.0)
    return jnp.dot(h2, w3, precision=jax.lax.Precision.HIGHEST) + b3


def critic_ref_fp32(state, action, params):
    """True fp32 reference matching the PyTorch module's numerics."""
    w1, b1, w2, b2, w3, b3 = params
    hi = jax.lax.Precision.HIGHEST
    x = jnp.concatenate([state, action], axis=1)
    h1 = jnp.maximum(jnp.dot(x, w1, precision=hi) + b1, 0.0)
    h2 = jnp.maximum(jnp.dot(h1, w2, precision=hi) + b2, 0.0)
    return jnp.dot(h2, w3, precision=hi) + b3


def _check(batch, state_size, action_size, key):
    k_s, k_a, k_p = jax.random.split(key, 3)
    state = jax.random.normal(k_s, (batch, state_size), jnp.float32)
    action = jax.random.normal(k_a, (batch, action_size), jnp.float32)
    params = init_params(k_p, state_size, action_size)
    prepared = prepare_params(params, state_size)

    out = jax.block_until_ready(critic_forward(state, action, prepared))
    assert out.shape == (batch, 1)

    ref_bf16 = critic_ref(state, action, params)
    assert jnp.allclose(out, ref_bf16, atol=5e-3, rtol=5e-3), (out, ref_bf16)

    # Also bound the deviation from the true fp32 PyTorch-equivalent model
    # (bf16 MXU products, fp32 accumulation -> small deterministic error).
    ref_fp32 = critic_ref_fp32(state, action, params)
    assert jnp.allclose(out, ref_fp32, atol=5e-2, rtol=5e-2), (out, ref_fp32)


if __name__ == "__main__":
    key = jax.random.PRNGKey(0)
    k0, k1 = jax.random.split(key, 2)

    # Small single-tile case (B=8, S=16, A=8).
    _check(batch=8, state_size=16, action_size=8, key=k0)
    # Multi-tile case exercising the parallel grid, ragged last block,
    # intra-tile chunking and the lane-dense partial store (B=600 -> tile 384).
    _check(batch=600, state_size=16, action_size=8, key=k1)

    print("KERNEL_OK")
</pallas_src>

<mosaic_0001>
module attributes {stable_mosaic.version = 11 : i64} {
  func.func @_critic_kernel(%arg0: i32, %arg1: memref<8x16xf32, #tpu.memory_space<vmem>>, %arg2: memref<8x8xf32, #tpu.memory_space<vmem>>, %arg3: memref<16x256xbf16, #tpu.memory_space<vmem>>, %arg4: memref<8x256xbf16, #tpu.memory_space<vmem>>, %arg5: memref<1x256xf32, #tpu.memory_space<vmem>>, %arg6: memref<256x256xbf16, #tpu.memory_space<vmem>>, %arg7: memref<1x256xf32, #tpu.memory_space<vmem>>, %arg8: memref<1x256xf32, #tpu.memory_space<vmem>>, %arg9: memref<1xf32, #tpu.memory_space<smem>>, %arg10: memref<1x8xf32, #tpu.memory_space<vmem>>) attributes {dimension_semantics = [#tpu.dimension_semantics<parallel>], iteration_bounds = array<i64: 1>, scalar_prefetch = 0 : i64, scratch_operands = 0 : i64, tpu.core_type = #tpu.core_type<tc>, window_params = [{transform_indices = @transform_0, window_bounds = array<i64: 8, 16>}, {transform_indices = @transform_1, window_bounds = array<i64: 8, 8>}, {pipeline_mode = #tpu.pipeline_mode<synchronous>, transform_indices = @transform_2, window_bounds = array<i64: 16, 256>}, {pipeline_mode = #tpu.pipeline_mode<synchronous>, transform_indices = @transform_3, window_bounds = array<i64: 8, 256>}, {pipeline_mode = #tpu.pipeline_mode<synchronous>, transform_indices = @transform_4, window_bounds = array<i64: 1, 256>}, {pipeline_mode = #tpu.pipeline_mode<synchronous>, transform_indices = @transform_5, window_bounds = array<i64: 256, 256>}, {pipeline_mode = #tpu.pipeline_mode<synchronous>, transform_indices = @transform_6, window_bounds = array<i64: 1, 256>}, {pipeline_mode = #tpu.pipeline_mode<synchronous>, transform_indices = @transform_7, window_bounds = array<i64: 1, 256>}, {transform_indices = @transform_8, window_bounds = array<i64: 1>}, {transform_indices = @transform_9, window_bounds = array<i64: 1, 8>}]} {
    %c0 = arith.constant 0 : index
    %c0_0 = arith.constant 0 : index
    %0 = vector.load %arg5[%c0, %c0_0] : memref<1x256xf32, #tpu.memory_space<vmem>>, vector<1x256xf32>
    %c0_1 = arith.constant 0 : index
    %c0_2 = arith.constant 0 : index
    %1 = vector.load %arg7[%c0_1, %c0_2] : memref<1x256xf32, #tpu.memory_space<vmem>>, vector<1x256xf32>
    %c0_3 = arith.constant 0 : index
    %c0_4 = arith.constant 0 : index
    %2 = vector.load %arg8[%c0_3, %c0_4] : memref<1x256xf32, #tpu.memory_space<vmem>>, vector<1x256xf32>
    %c0_5 = arith.constant 0 : index
    %3 = memref.load %arg9[%c0_5] : memref<1xf32, #tpu.memory_space<smem>>
    %c0_6 = arith.constant 0 : index
    %c0_7 = arith.constant 0 : index
    %4 = vector.load %arg1[%c0_6, %c0_7] : memref<8x16xf32, #tpu.memory_space<vmem>>, vector<8x16xf32>
    %5 = arith.truncf %4 : vector<8x16xf32> to vector<8x16xbf16>
    %c0_8 = arith.constant 0 : index
    %c0_9 = arith.constant 0 : index
    %6 = vector.load %arg2[%c0_8, %c0_9] : memref<8x8xf32, #tpu.memory_space<vmem>>, vector<8x8xf32>
    %7 = arith.truncf %6 : vector<8x8xf32> to vector<8x8xbf16>
    %c0_10 = arith.constant 0 : index
    %c0_11 = arith.constant 0 : index
    %8 = vector.load %arg3[%c0_10, %c0_11] : memref<16x256xbf16, #tpu.memory_space<vmem>>, vector<16x256xbf16>
    %cst = arith.constant dense<0.000000e+00> : vector<8x256xf32>
    %9 = tpu.matmul %5, %8, %cst {dimension_numbers = #tpu.dot_dimension_numbers<[1], [0], [0], [1], [0, 0, 1, 1], [], []>} : vector<8x16xbf16>, vector<16x256xbf16>, vector<8x256xf32> -> vector<8x256xf32>
    %c0_12 = arith.constant 0 : index
    %c0_13 = arith.constant 0 : index
    %10 = vector.load %arg4[%c0_12, %c0_13] : memref<8x256xbf16, #tpu.memory_space<vmem>>, vector<8x256xbf16>
    %cst_14 = arith.constant dense<0.000000e+00> : vector<8x256xf32>
    %11 = tpu.matmul %7, %10, %cst_14 {dimension_numbers = #tpu.dot_dimension_numbers<[1], [0], [0], [1], [0, 0, 1, 1], [], []>} : vector<8x8xbf16>, vector<8x256xbf16>, vector<8x256xf32> -> vector<8x256xf32>
    %12 = arith.addf %9, %11 : vector<8x256xf32>
    %13 = vector.broadcast %0 : vector<1x256xf32> to vector<8x256xf32>
    %14 = arith.addf %12, %13 : vector<8x256xf32>
    %cst_15 = arith.constant 0.000000e+00 : f32
    %15 = vector.broadcast %cst_15 : f32 to vector<8x256xf32>
    %16 = arith.maximumf %14, %15 : vector<8x256xf32>
    %17 = arith.truncf %16 : vector<8x256xf32> to vector<8x256xbf16>
    %c0_16 = arith.constant 0 : index
    %c0_17 = arith.constant 0 : index
    %18 = vector.load %arg6[%c0_16, %c0_17] : memref<256x256xbf16, #tpu.memory_space<vmem>>, vector<256x256xbf16>
    %cst_18 = arith.constant dense<0.000000e+00> : vector<8x256xf32>
    %19 = tpu.matmul %17, %18, %cst_18 {dimension_numbers = #tpu.dot_dimension_numbers<[1], [0], [0], [1], [0, 0, 1, 1], [], []>} : vector<8x256xbf16>, vector<256x256xbf16>, vector<8x256xf32> -> vector<8x256xf32>
    %20 = vector.broadcast %1 : vector<1x256xf32> to vector<8x256xf32>
    %21 = arith.addf %19, %20 : vector<8x256xf32>
    %cst_19 = arith.constant 0.000000e+00 : f32
    %22 = vector.broadcast %cst_19 : f32 to vector<8x256xf32>
    %23 = arith.maximumf %21, %22 : vector<8x256xf32>
    %24 = vector.broadcast %2 : vector<1x256xf32> to vector<8x256xf32>
    %25 = arith.mulf %23, %24 : vector<8x256xf32>
    %cst_20 = arith.constant dense<0.000000e+00> : vector<8xf32>
    %26 = vector.multi_reduction <add>, %25, %cst_20 [1] : vector<8x256xf32> to vector<8xf32>
    %27 = vector.shape_cast %26 : vector<8xf32> to vector<8x1xf32>
    %28 = vector.broadcast %3 : f32 to vector<8x1xf32>
    %29 = arith.addf %27, %28 : vector<8x1xf32>
    %30 = tpu.transpose %29, [1, 0] : vector<8x1xf32> -> vector<1x8xf32>
    %c0_21 = arith.constant 0 : index
    %c0_22 = arith.constant 0 : index
    %31 = vector.load %arg10[%c0_21, %c0_22] : memref<1x8xf32, #tpu.memory_space<vmem>>, vector<1x8xf32>
    tpu.vector_store %arg10[%c0_21, %c0_22], %30 {strides = array<i32>} : memref<1x8xf32, #tpu.memory_space<vmem>>, vector<1x8xf32>,
    return
  }
  func.func @transform_0(%arg0: i32) -> (i32, i32) {
    %c0_i32 = arith.constant 0 : i32
    %c0_i32_0 = arith.constant 0 : i32
    return %arg0, %c0_i32 : i32, i32
  }
  func.func @transform_1(%arg0: i32) -> (i32, i32) {
    %c0_i32 = arith.constant 0 : i32
    %c0_i32_0 = arith.constant 0 : i32
    return %arg0, %c0_i32 : i32, i32
  }
  func.func @transform_2(%arg0: i32) -> (i32, i32) {
    %c0_i32 = arith.constant 0 : i32
    %c0_i32_0 = arith.constant 0 : i32
    %c0_i32_1 = arith.constant 0 : i32
    return %c0_i32, %c0_i32_0 : i32, i32
  }
  func.func @transform_3(%arg0: i32) -> (i32, i32) {
    %c0_i32 = arith.constant 0 : i32
    %c0_i32_0 = arith.constant 0 : i32
    %c0_i32_1 = arith.constant 0 : i32
    return %c0_i32, %c0_i32_0 : i32, i32
  }
  func.func @transform_4(%arg0: i32) -> (i32, i32) {
    %c0_i32 = arith.constant 0 : i32
    %c0_i32_0 = arith.constant 0 : i32
    %c0_i32_1 = arith.constant 0 : i32
    return %c0_i32, %c0_i32_0 : i32, i32
  }
  func.func @transform_5(%arg0: i32) -> (i32, i32) {
    %c0_i32 = arith.constant 0 : i32
    %c0_i32_0 = arith.constant 0 : i32
    %c0_i32_1 = arith.constant 0 : i32
    return %c0_i32, %c0_i32_0 : i32, i32
  }
  func.func @transform_6(%arg0: i32) -> (i32, i32) {
    %c0_i32 = arith.constant 0 : i32
    %c0_i32_0 = arith.constant 0 : i32
    %c0_i32_1 = arith.constant 0 : i32
    return %c0_i32, %c0_i32_0 : i32, i32
  }
  func.func @transform_7(%arg0: i32) -> (i32, i32) {
    %c0_i32 = arith.constant 0 : i32
    %c0_i32_0 = arith.constant 0 : i32
    %c0_i32_1 = arith.constant 0 : i32
    return %c0_i32, %c0_i32_0 : i32, i32
  }
  func.func @transform_8(%arg0: i32) -> i32 {
    %c0_i32 = arith.constant 0 : i32
    %c0_i32_0 = arith.constant 0 : i32
    return %c0_i32 : i32
  }
  func.func @transform_9(%arg0: i32) -> (i32, i32) {
    %c0_i32 = arith.constant 0 : i32
    %c0_i32_0 = arith.constant 0 : i32
    return %c0_i32, %arg0 : i32, i32
  }
}

</mosaic_0001>

<bundles_post_ra>
// kernel: tpu_custom_call.1
= control target key start
LH: loop header
LB: loop body
LE: loop exit
PB: predicated region body
PF: predicated region fallthrough
CT: control target
= control target key end

     0   :  { %15 = vsyncpa [#allocation4], 0  ;;  %s893_s0 = inlined_call_operand.hbm [shape: f32[8,16], index: 0, kind: input, shape index: {}]   ;;  %s894_s1 = inlined_call_operand.hbm [shape: f32[8,8], index: 1, kind: input, shape index: {}]   ;;  %s895_s2 = inlined_call_operand.hbm [shape: bf16[16,256], index: 2, kind: input, shape index: {}]   ;;  %s896_s3 = inlined_call_operand.vmem [shape: bf16[8,256], index: 3, kind: input, shape index: {}]   ;;  %s897_s4 = inlined_call_operand.vmem [shape: f32[1,256], index: 4, kind: input, shape index: {}]   ;;  %s898_s5 = inlined_call_operand.hbm [shape: bf16[256,256], index: 5, kind: input, shape index: {}]   ;;  %s899_s6 = inlined_call_operand.vmem [shape: f32[1,256], index: 6, kind: input, shape index: {}]   ;;  %s900_s7 = inlined_call_operand.vmem [shape: f32[1,256], index: 7, kind: input, shape index: {}]   ;;  %s901_s8 = inlined_call_operand.<no memory space> [shape: f32[1], index: 8, kind: input, shape index: {}]   ;;  %s902_s9 = inlined_call_operand.hbm [shape: f32[1,8], index: 9, kind: output, shape index: {}]  }
   0x1   :  { %16 = vsyncpa [#allocation7], 0 }
   0x2   :  { %17 = vsyncpa [#allocation10], 0 }
   0x3   :  { %18 = vsyncpa [#allocation5], 0  ;;  %s760_s30 = smov [#allocation6]   ;;  %s761_s11 = smov [#allocation3]  }
   0x4   :  { %s35_s10 = sshll.u32 %s760_s30, 4  ;;  %s25_s12 = sshll.u32 %s761_s11, 4  ;;  %s36_s10 = int_to_ptr.vmem [resolvable:$true] %s35_s10  ;;  %s26_s12 = int_to_ptr.vmem [resolvable:$true] %s25_s12 }
   0x5   :  { %s642_s15 = scalar_lea.hbm %s894_s1, 128 }
   0x6   :  { %p643_p0 = scmp.ne.s32.totalorder %s894_s1, %s642_s15  ;;  %p646_p1 = scmp.lt.u32.totalorder %s642_s15, %s894_s1 }
   0x8   :  { %p648_p2 = pnand %p646_p1, %p643_p0 }
   0xa   :  { %651 = shalt.err (!%p648_p2)
}
   0xb   :  { %s652_s20 = scalar_lea.vmem %s36_s10, 128  ;;  %p657_p4 = scmp.lt.s32.totalorder %s36_s10, %s36_s10 }
   0xc   :  { %p653_p3 = scmp.ne.s32.totalorder %s36_s10, %s652_s20  ;;  %p658_p5 = scmp.lt.s32.totalorder %s652_s20, %s652_s20 }
   0xe   :  { %p659_p6 = por %p658_p5, %p657_p4 }
  0x10   :  { %p660_p7 = pnand %p659_p6, %p653_p3 }
  0x12   :  { %663 = shalt.err (!%p660_p7)
}
  0x13   :  { %38 = dma.hbm_to_vmem [thread:$0]  %s894_s1, 128, %s36_s10, [#allocation7]  }
  0x14   :  { %s664_s25 = scalar_lea.hbm %s893_s0, 128 }
  0x15   :  { %p665_p8 = scmp.ne.s32.totalorder %s893_s0, %s664_s25  ;;  %p668_p9 = scmp.lt.u32.totalorder %s664_s25, %s893_s0 }
  0x17   :  { %p670_p10 = pnand %p668_p9, %p665_p8 }
  0x19   :  { %673 = shalt.err (!%p670_p10)
}
  0x1a   :  { %s674_s30 = scalar_lea.vmem %s26_s12, 128  ;;  %p679_p12 = scmp.lt.s32.totalorder %s26_s12, %s26_s12 }
  0x1b   :  { %p675_p11 = scmp.ne.s32.totalorder %s26_s12, %s674_s30  ;;  %p680_p13 = scmp.lt.s32.totalorder %s674_s30, %s674_s30 }
  0x1d   :  { %p681_p0 = por %p680_p13, %p679_p12 }
  0x1f   :  { %p682_p1 = pnand %p681_p0, %p675_p11 }
  0x21   :  { %685 = shalt.err (!%p682_p1)
}
  0x22   :  { %28 = dma.hbm_to_vmem [thread:$0]  %s893_s0, 128, %s26_s12, [#allocation4]  }
  0x23   :  { %s762_s11 = smov [#allocation8]   ;;  %s686_s16 = scalar_lea.hbm %s895_s2, 256 }
  0x24   :  { %s44_s13 = sshll.u32 %s762_s11, 4  ;;  %p687_p2 = scmp.ne.s32.totalorder %s895_s2, %s686_s16  ;;  %s45_s13 = int_to_ptr.vmem [resolvable:$true] %s44_s13 }
  0x25   :  { %p690_p3 = scmp.lt.u32.totalorder %s686_s16, %s895_s2 }
  0x27   :  { %p692_p4 = pnand %p690_p3, %p687_p2 }
  0x29   :  { %695 = shalt.err (!%p692_p4)
}
  0x2a   :  { %s696_s21 = scalar_lea.vmem %s45_s13, 256  ;;  %p701_p6 = scmp.lt.s32.totalorder %s45_s13, %s45_s13 }
  0x2b   :  { %p697_p5 = scmp.ne.s32.totalorder %s45_s13, %s696_s21  ;;  %p702_p7 = scmp.lt.s32.totalorder %s696_s21, %s696_s21 }
  0x2d   :  { %p703_p8 = por %p702_p7, %p701_p6 }
  0x2f   :  { %p704_p9 = pnand %p703_p8, %p697_p5 }
  0x31   :  { %707 = shalt.err (!%p704_p9)
}
  0x32   :  { %s763_s0 = smov 128   ;;  %s764_s12 = smov 8  }
  0x33   :  { %50 = dma.hbm_to_vmem [thread:$0]  %s895_s2, 256, %s45_s13, [#allocation7], %s763_s0, %s763_s0, %s764_s12  }
  0x34   :  { %s765_s24 = smov [#allocation9]   ;;  %s708_s28 = scalar_lea.hbm %s898_s5, 4096 }
  0x35   :  { %s60_s25 = sshll.u32 %s765_s24, 4  ;;  %p709_p10 = scmp.ne.s32.totalorder %s898_s5, %s708_s28  ;;  %s61_s25 = int_to_ptr.vmem [resolvable:$true] %s60_s25 }
  0x36   :  { %p712_p11 = scmp.lt.u32.totalorder %s708_s28, %s898_s5 }
  0x38   :  { %p714_p12 = pnand %p712_p11, %p709_p10 }
  0x3a   :  { %717 = shalt.err (!%p714_p12)
}
  0x3b   :  { %s718_s11 = scalar_lea.vmem %s61_s25, 4096  ;;  %p723_p0 = scmp.lt.s32.totalorder %s61_s25, %s61_s25 }
  0x3c   :  { %p719_p13 = scmp.ne.s32.totalorder %s61_s25, %s718_s11  ;;  %p724_p1 = scmp.lt.s32.totalorder %s718_s11, %s718_s11 }
  0x3e   :  { %p725_p2 = por %p724_p1, %p723_p0 }
  0x40   :  { %p726_p3 = pnand %p725_p2, %p719_p13 }
  0x42   :  { %729 = shalt.err (!%p726_p3)
}
  0x43   :  { %66 = dma.hbm_to_vmem [thread:$0]  %s898_s5, 4096, %s61_s25, [#allocation10], %s763_s0, %s763_s0, %s764_s12  }
  0x44   :  { %752 = dma.done.wait [#allocation4], 128  }
  0x45   :  { %753 = vsyncadd [#allocation4], 4294967168 }
  0x46   :  { %754 = dma.done.wait [#allocation7], 384  }
  0x47   :  { %755 = vsyncadd [#allocation7], 4294966912 }
  0x48   :  { %756 = dma.done.wait [#allocation10], 4096  }
  0x49   :  { %757 = vsyncadd [#allocation10], 4294963200  ;;  %v766_v0 = vmov 0   ;;  %v96_v1 = vld [vmem:[%s896_s3] sm:$0xff]  ;;  %vm106_vm0 = vcmask 1043456   ;;  %v92_v2 = vld [vmem:[#allocation6] sm:$0xff]  ;;  %v210_v43 = vlaneseq }
  0x4a   :  { %145 = vmatprep.mubr.bf16.mxu1 %v766_v0  ;;  %v542_v3 = vcombine.high %v96_v1, %v96_v1  ;;  %v541_v4 = vcombine.low %v96_v1, %v96_v1  ;;  %v593_v5 = vld [vmem:[#allocation8 + $0x4] ss:$8 sps:$4 sm:$0xff]   ;;  %v93_v7 = vpack.c.bf16 %v92_v2, %v92_v2  ;;  %v594_v8 = vld [vmem:[#allocation9 + $0x4] ss:$8 sps:$4 sm:$0xff]   ;;  %v596_v9 = vld [vmem:[#allocation9] ss:$8 sps:$4 sm:$0xff]  }
  0x4b   :  { %vm102_vm1 = vcmask 64512   ;;  %v591_v10 = vld [vmem:[#allocation8] ss:$8 sps:$4 sm:$0xff]   ;;  %v597_v11 = vld [vmem:[#allocation9 + $0x14] ss:$8 sps:$4 sm:$0xff]   ;;  %429 = vmatprep.subr.bf16.mxu0 %v594_v8  ;;  %v90_v14 = vld [vmem:[#allocation3] sm:$0xff] }
  0x4c   :  { %543 = vmatprep.subr.msk.bf16.mxu1 %vm106_vm0, %v542_v3  ;;  %v108_v6 = vsel %vm106_vm0, %v541_v4, 0  ;;  %430 = vmatpush1.bf16.msra.mxu0 %v596_v9  ;;  %v599_v12 = vld [vmem:[#allocation9 + $0x10] ss:$8 sps:$4 sm:$0xff]   ;;  %v600_v13 = vld [vmem:[#allocation9 + $0x24] ss:$8 sps:$4 sm:$0xff]   ;;  %v91_v16 = vpack.c.bf16 %v90_v14, %v90_v14  ;;  %vm164_vm2 = vcmask 130048  }
  0x4d   :  { %114 = vmatpush1.bf16.msra.mxu1 %v108_v6  ;;  %431 = vmatprep.subr.bf16.mxu0 %v597_v11  ;;  %v602_v15 = vld [vmem:[#allocation9 + $0x20] ss:$8 sps:$4 sm:$0xff]   ;;  %v603_v17 = vld [vmem:[#allocation9 + $0x34] ss:$8 sps:$4 sm:$0xff]   ;;  %v605_v18 = vld [vmem:[#allocation9 + $0x30] ss:$8 sps:$4 sm:$0xff]  }
  0x4e   :  { %168 = vmatprep.subr.bf16.mxu1 %v593_v5  ;;  %v606_v19 = vld [vmem:[#allocation9 + $0x44] ss:$8 sps:$4 sm:$0xff]   ;;  %v608_v20 = vld [vmem:[#allocation9 + $0x40] ss:$8 sps:$4 sm:$0xff]   ;;  %v609_v21 = vld [vmem:[#allocation9 + $0x54] ss:$8 sps:$4 sm:$0xff]  }
  0x4f   :  { %v611_v22 = vld [vmem:[#allocation9 + $0x50] ss:$8 sps:$4 sm:$0xff]   ;;  %v612_v23 = vld [vmem:[#allocation9 + $0x64] ss:$8 sps:$4 sm:$0xff]   ;;  %v614_v24 = vld [vmem:[#allocation9 + $0x60] ss:$8 sps:$4 sm:$0xff]  }
  0x50   :  { %544 = vmatmul.mubr.msk.bf16.vlgmr.msra.gmra.mrb[0].mxu1 %vm102_vm1, %v93_v7  ;;  %432 = vmatpush1.bf16.msra.mxu0 %v599_v12  ;;  %v615_v25 = vld [vmem:[#allocation9 + $0x74] ss:$8 sps:$4 sm:$0xff]   ;;  %v617_v26 = vld [vmem:[#allocation9 + $0x70] ss:$8 sps:$4 sm:$0xff]   ;;  %v618_v27 = vld [vmem:[#allocation9 + $0x84] ss:$8 sps:$4 sm:$0xff]  }
  0x51   :  { %169 = vmatpush1.bf16.msra.mxu1 %v591_v10  ;;  %200 = vmatprep.mubr.bf16.mxu1 %v766_v0  ;;  %v620_v28 = vld [vmem:[#allocation9 + $0x80] ss:$8 sps:$4 sm:$0xff]   ;;  %v621_v29 = vld [vmem:[#allocation9 + $0x94] ss:$8 sps:$4 sm:$0xff]   ;;  %v623_v30 = vld [vmem:[#allocation9 + $0x90] ss:$8 sps:$4 sm:$0xff]  }
  0x52   :  { %433 = vmatprep.subr.bf16.mxu0 %v600_v13  ;;  %v624_v31 = vld [vmem:[#allocation9 + $0xa4] ss:$8 sps:$4 sm:$0xff]   ;;  %v626_v32 = vld [vmem:[#allocation9 + $0xa0] ss:$8 sps:$4 sm:$0xff]   ;;  %v627_v33 = vld [vmem:[#allocation9 + $0xb4] ss:$8 sps:$4 sm:$0xff]  }
  0x53   :  { %v629_v34 = vld [vmem:[#allocation9 + $0xb0] ss:$8 sps:$4 sm:$0xff]   ;;  %v630_v35 = vld [vmem:[#allocation9 + $0xc4] ss:$8 sps:$4 sm:$0xff]   ;;  %v632_v36 = vld [vmem:[#allocation9 + $0xc0] ss:$8 sps:$4 sm:$0xff]  }
  0x54   :  { %434 = vmatpush1.bf16.msra.mxu0 %v602_v15  ;;  %v633_v37 = vld [vmem:[#allocation9 + $0xd4] ss:$8 sps:$4 sm:$0xff]   ;;  %v635_v38 = vld [vmem:[#allocation9 + $0xd0] ss:$8 sps:$4 sm:$0xff]   ;;  %v636_v39 = vld [vmem:[#allocation9 + $0xe4] ss:$8 sps:$4 sm:$0xff]  }
  0x55   :  { %435 = vmatprep.subr.bf16.mxu0 %v603_v17  ;;  %v638_v40 = vld [vmem:[#allocation9 + $0xe0] ss:$8 sps:$4 sm:$0xff]   ;;  %v639_v41 = vld [vmem:[#allocation9 + $0xf4] ss:$8 sps:$4 sm:$0xff]   ;;  %v641_v42 = vld [vmem:[#allocation9 + $0xf0] ss:$8 sps:$4 sm:$0xff]  }
  0x56   :  { %v211_v44 = vshrl.u32 %v210_v43, 7  ;;  %v86_v50 = vld [vmem:[%s897_s4] sm:$0x3]  ;;  %vm522_vm3 = vcmask 57344  }
  0x57   :  { %v87_v2 = vld [vmem:[%s899_s6] sm:$0x3] }
  0x58   :  { %547 = vmatmul.mubr.msk.bf16.vlgmr.msra.gmra.mrb[4].mxu1 %vm164_vm2, %v91_v16  ;;  %436 = vmatpush1.bf16.msra.mxu0 %v605_v18  ;;  %v212_v49 = vsub.s32 0, %v211_v44  ;;  %v216_v51 = vsub.s32 1, %v211_v44  ;;  %v88_v5 = vld [vmem:[%s900_s7] sm:$0x3]  ;;  %s767_s7 = smov [#allocation11]  }
  0x59   :  { %437 = vmatprep.subr.bf16.mxu0 %v606_v19  ;;  %v488_v19 = vstv %s901_s8  ;;  %s530_s20 = sshll.u32 %s767_s7, 4  ;;  %s531_s20 = int_to_ptr.vmem [resolvable:$true] %s530_s20 }
  0x5a   :  { %v213_v52 = vrot.slane %v86_v50, %v212_v49  ;;  %v217_v54 = vrot.slane %v86_v50, %v216_v51  ;;  %v262_v3 = vrot.slane %v87_v2, %v212_v49  ;;  %v266_v4 = vrot.slane %v87_v2, %v216_v51  ;;  %s730_s21 = scalar_lea.vmem %s531_s20, 16  ;;  %s734_s0 = scalar_lea.vmem %s531_s20, 32 }
  0x5b   :  { %v476_v9 = vrot.slane %v88_v5, %v212_v49  ;;  %v480_v12 = vrot.slane %v88_v5, %v216_v51  ;;  %p731_p4 = scmp.ne.s32.totalorder %s531_s20, %s730_s21  ;;  %p735_p5 = scmp.lt.s32.totalorder %s531_s20, %s531_s20 }
  0x5c   :  { %438 = vmatpush1.bf16.msra.mxu0 %v608_v20  ;;  %p736_p6 = scmp.lt.s32.totalorder %s734_s0, %s730_s21 }
  0x5d   :  { %439 = vmatprep.subr.bf16.mxu0 %v609_v21 }
  0x5e   :  { %p737_p7 = por %p736_p6, %p735_p5 }
  0x60   :  { %440 = vmatpush1.bf16.msra.mxu0 %v611_v22  ;;  %p738_p8 = pnand %p737_p7, %p731_p4 }
  0x61   :  { %441 = vmatprep.subr.bf16.mxu0 %v612_v23 }
  0x64   :  { %442 = vmatpush1.bf16.msra.mxu0 %v614_v24 }
  0x65   :  { %443 = vmatprep.subr.bf16.mxu0 %v615_v25 }
  0x68   :  { %444 = vmatpush1.bf16.msra.mxu0 %v617_v26 }
  0x69   :  { %445 = vmatprep.subr.bf16.mxu0 %v618_v27 }
  0x6c   :  { %446 = vmatpush1.bf16.msra.mxu0 %v620_v28 }
  0x6d   :  { %447 = vmatprep.subr.bf16.mxu0 %v621_v29 }
  0x70   :  { %448 = vmatpush1.bf16.msra.mxu0 %v623_v30 }
  0x71   :  { %449 = vmatprep.subr.bf16.mxu0 %v624_v31 }
  0x74   :  { %450 = vmatpush1.bf16.msra.mxu0 %v626_v32 }
  0x75   :  { %451 = vmatprep.subr.bf16.mxu0 %v627_v33 }
  0x78   :  { %452 = vmatpush1.bf16.msra.mxu0 %v629_v34 }
  0x79   :  { %453 = vmatprep.subr.bf16.mxu0 %v630_v35 }
  0x7c   :  { %454 = vmatpush1.bf16.msra.mxu0 %v632_v36 }
  0x7d   :  { %455 = vmatprep.subr.bf16.mxu0 %v633_v37 }
  0x80   :  { %456 = vmatpush1.bf16.msra.mxu0 %v635_v38 }
  0x81   :  { %457 = vmatprep.subr.bf16.mxu0 %v636_v39 }
  0x84   :  { %458 = vmatpush1.bf16.msra.mxu0 %v638_v40 }
  0x85   :  { %459 = vmatprep.subr.bf16.mxu0 %v639_v41 }
  0x88   :  { %460 = vmatpush1.bf16.msra.mxu0 %v641_v42 }
 0x123   :  { %v147_v45 = vpop.f32.mrb[0].mxu1 }
 0x124   :  { %v149_v46 = vpop.f32.mrb[1].mxu1 }
 0x125   :  { %v151_v47 = vpop.f32.mrb[2].mxu1 }
 0x126   :  { %v152_v48 = vpop.f32.mrb[3].mxu1 }
 0x12b   :  { %v202_v53 = vpop.f32.mrb[4].mxu1 }
 0x12c   :  { %v203_v55 = vadd.f32 %v202_v53, %v147_v45  ;;  %v204_v56 = vpop.f32.mrb[5].mxu1 }
 0x12d   :  { %v205_v57 = vadd.f32 %v204_v56, %v149_v46  ;;  %v206_v58 = vpop.f32.mrb[6].mxu1 }
 0x12e   :  { %v220_v59 = vadd.f32 %v213_v52, %v203_v55  ;;  %v207_v60 = vpop.f32.mrb[7].mxu1 }
 0x12f   :  { %v221_v61 = vadd.f32 %v217_v54, %v205_v57 }
 0x130   :  { %v222_v62 = vmax.f32 %v220_v59, 0.0 }
 0x131   :  { %v223_v63 = vmax.f32 %v221_v61, 0.0 }
 0x132   :  { %v224_v1 = vpack.c.bf16 %v222_v62, %v222_v62 }
 0x133   :  { %v225_v0 = vpack.c.bf16 %v223_v63, %v223_v63 }
 0x135   :  { %461 = vmatprep.mubr.bf16.mxu0 %v225_v0 }
 0x136   :  { %462 = vmatmul.mubr.bf16.vlgmr.msra.gmra.mrb[0].mxu0 %v224_v1 }
 0x209   :  { %v463_v6 = vpop.f32.mrb[0].mxu0 }
 0x20a   :  { %v464_v7 = vadd.f32 %v463_v6, %v262_v3  ;;  %v465_v8 = vpop.f32.mrb[1].mxu0 }
 0x20b   :  { %v466_v10 = vadd.f32 %v465_v8, %v266_v4  ;;  %v467_v11 = vpop.f32.mrb[2].mxu0 }
 0x20c   :  { %v470_v13 = vmax.f32 %v464_v7, 0.0  ;;  %v468_v14 = vpop.f32.mrb[3].mxu0 }
 0x20d   :  { %v471_v15 = vmax.f32 %v466_v10, 0.0 }
 0x20e   :  { %v483_v16 = vmul.f32 %v476_v9, %v470_v13 }
 0x20f   :  { %v484_v17 = vmul.f32 %v480_v12, %v471_v15 }
 0x211   :  { %v485_v18 = vadd.f32 %v484_v17, %v483_v16 }
 0x213   :  { %486 = vadd.xlane.f32.xlu0 %v485_v18 }
 0x2a0   :  { %v487_v20 = vpop.xlane.xlu0 %486 }
 0x2a1   :  { %v489_v21 = vadd.f32 %v488_v19, %v487_v20 }
 0x2a3   :  { %490 = vxpose.xlu0.b32.start.end [1/1] (short) (narrow) %v489_v21, 8 }
 0x323   :  { %v506_v22 = vpop.trf.xlu0 }
 0x324   :  { %523 = vst.msk [vmem:[#allocation11] sm:$0x1] %vm522_vm3, %v506_v22 }
 0x325   :  { %741 = shalt.err (!%p738_p8)
}
 0x326   :  { %s742_s8 = scalar_lea.hbm %s902_s9, 16 }
 0x327   :  { %p743_p9 = scmp.ne.s32.totalorder %s902_s9, %s742_s8  ;;  %p746_p10 = scmp.lt.u32.totalorder %s742_s8, %s902_s9 }
 0x329   :  { %p748_p11 = pnand %p746_p10, %p743_p9 }
 0x32b   :  { %751 = shalt.err (!%p748_p11)
}
 0x32c   :  { %533 = dma.vmem_to_hbm [thread:$0]  %s531_s20, 16, %s902_s9, [#allocation5]  }
 0x32d   :  { %758 = dma.done.wait [#allocation5], 16  }
 0x32e   :  { %759 = vsyncadd [#allocation5], 4294967280 }
 0x32f   :  { %537 = vsyncpa [#allocation4], 1 }
 0x330   :  { %538 = vsyncpa [#allocation7], 1 }
 0x331   :  { %539 = vsyncpa [#allocation10], 1 }
 0x332   :  { %540 = vsyncpa [#allocation5], 1 }

</bundles_post_ra>
